<compile_context>
chip_gen: v7x
topology: tpu7x:2x2x1
jax: 0.10.0
libtpu: 0.0.40
codegen_flags: <defaults>
</compile_context>

<pallas_src>
import functools

import jax
import jax.numpy as jnp
from jax.experimental import pallas as pl
from jax.experimental.pallas import tpu as pltpu


# ---------------------------------------------------------------------------
# Kernels
# ---------------------------------------------------------------------------

def _distmult_fused_kernel(hid_ref, tid_ref, rid_ref, nodeT_ref, relaT_ref,
                           o_ref):
    """Gathers + scoring fully in VMEM.

    hid/tid/rid_ref: (1, blk) int32 lane tiles of ids.
    nodeT_ref: (D, V) node table (VMEM-resident, constant block index).
    relaT_ref: (D, R) relation table (VMEM-resident).
    o_ref:     (1, blk) float32 lane-dense scores.
    """
    nodeT = nodeT_ref[...].astype(jnp.float32)     # (D, V)
    relaT = relaT_ref[...].astype(jnp.float32)     # (D, R)
    blk = hid_ref.shape[1]

    def gather_cols(tableT, ids_row):
        # tableT: (D, N); ids_row: (1, blk)  ->  (D, blk) gathered columns.
        n = tableT.shape[1]
        iota = jax.lax.broadcasted_iota(jnp.int32, (n, blk), 0)
        onehot = (iota == ids_row).astype(jnp.float32)           # (N, blk)
        # One-hot "gather" as a matmul on the MXU (free slot; mem-bound kernel).
        return jnp.dot(tableT, onehot, preferred_element_type=jnp.float32)

    h = gather_cols(nodeT, hid_ref[...])           # (D, blk)
    t = gather_cols(nodeT, tid_ref[...])           # (D, blk)
    r = gather_cols(relaT, rid_ref[...])           # (D, blk)

    # Triple product on the VPU; sublane reduce over D -> lane-dense (1, blk).
    o_ref[...] = jnp.sum(h * r * t, axis=0, keepdims=True)


def _distmult_stream_kernel(h_ref, t_ref, r_ref, o_ref):
    """Pre-gathered operands in natural row-major [blk, D] layout."""
    h = h_ref[...].astype(jnp.float32)
    t = t_ref[...].astype(jnp.float32)
    r = r_ref[...].astype(jnp.float32)
    o_ref[...] = jnp.sum(h * r * t, axis=-1, keepdims=True)      # (blk, 1)


# ---------------------------------------------------------------------------
# Wrapper
# ---------------------------------------------------------------------------

def _round_up(x, m):
    return -(-x // m) * m


def _vmem_capacity_bytes():
    try:
        return int(pltpu.get_tpu_info().vmem_capacity_bytes)
    except Exception:
        return 64 * 1024 * 1024      # conservative fallback (v7x per-TC VMEM)


@functools.partial(jax.jit, static_argnames=("block_b", "force_streaming"))
def rela_distmult_forward(node_emb, rela_emb, head_ids, tail_ids, rela_ids,
                          block_b=1024, force_streaming=False):
    """DistMult scores sum(node[h] * rela[r] * node[t], -1); shape [B], f32."""
    V, D = node_emb.shape
    R, Dr = rela_emb.shape
    assert Dr == D, "DistMult scoring needs rela_embed_dim == node_embed_dim"
    B = head_ids.shape[0]

    n_isz = jnp.dtype(node_emb.dtype).itemsize
    r_isz = jnp.dtype(rela_emb.dtype).itemsize

    # --- generation-aware VMEM budgeting (128 MiB v5e/v6e, 64 MiB/TC v7x) ---
    cap = _vmem_capacity_bytes()
    vmem_limit = (cap * 3) // 4                     # raised scoped limit
    tile_budget = (vmem_limit * 3) // 5             # headroom for out/scratch

    table_bytes = 2 * (V * D * n_isz + R * D * r_isz)   # double-buffer worst case
    use_fused = ((not force_streaming) and V <= 512 and R <= 512
                 and table_bytes <= tile_budget // 2)

    # --- pick the batch tile: multiple of 128, as wide as VMEM allows ---
    if use_fused:
        # resident tables + (per column) one-hots, f32 intermediates, id tiles
        per_col = 4 * (2 * V + R) + 16 * D + 3 * 2 * 8 * 4
        cap_cols = max(128, (max(tile_budget - table_bytes, 0) // per_col))
    else:
        # 3 streamed operands x double buffer + f32 upcast intermediates
        per_col = 2 * D * (2 * n_isz + r_isz) + 16 * D
        cap_cols = max(128, tile_budget // per_col)
    blk = min(max(int(block_b), 128), int(cap_cols), 4096, _round_up(B, 128))
    blk = max(128, (blk // 128) * 128)

    n_blocks = -(-B // blk)
    Bp = n_blocks * blk
    pad = Bp - B
    if pad:   # row 0 is a valid index; padded scores are sliced off below
        head_ids = jnp.pad(head_ids, (0, pad))
        tail_ids = jnp.pad(tail_ids, (0, pad))
        rela_ids = jnp.pad(rela_ids, (0, pad))
    head_ids = head_ids.astype(jnp.int32)
    tail_ids = tail_ids.astype(jnp.int32)
    rela_ids = rela_ids.astype(jnp.int32)

    compiler_params = pltpu.CompilerParams(
        dimension_semantics=("parallel",),
        vmem_limit_bytes=int(vmem_limit),
    )

    if use_fused:
        # Tables transposed ONCE (tiny, V*D / R*D) so the in-kernel gather is a
        # plain (D,V)@(V,blk) matmul and the output stays lane-dense.
        nodeT = node_emb.T                           # (D, V)
        relaT = rela_emb.T                           # (D, R)
        hid2d = head_ids.reshape(1, Bp)
        tid2d = tail_ids.reshape(1, Bp)
        rid2d = rela_ids.reshape(1, Bp)

        id_spec = pl.BlockSpec((1, blk), lambda i: (0, i))
        node_spec = pl.BlockSpec((D, V), lambda i: (0, 0))
        rela_spec = pl.BlockSpec((D, R), lambda i: (0, 0))
        out_spec = pl.BlockSpec((1, blk), lambda i: (0, i))

        cost = pl.CostEstimate(
            flops=int(2 * Bp * D * (2 * V + R) + 3 * Bp * D),
            transcendentals=0,
            bytes_accessed=int(V * D * n_isz + R * D * r_isz + 4 * Bp * 4),
        )
        scores = pl.pallas_call(
            _distmult_fused_kernel,
            out_shape=jax.ShapeDtypeStruct((1, Bp), jnp.float32),
            grid_spec=pltpu.PrefetchScalarGridSpec(
                num_scalar_prefetch=0,
                grid=(n_blocks,),
                in_specs=[id_spec, id_spec, id_spec, node_spec, rela_spec],
                out_specs=out_spec,
            ),
            compiler_params=compiler_params,
            cost_estimate=cost,
        )(hid2d, tid2d, rid2d, nodeT, relaT)
        return scores[0, :B]

    # Streaming fallback (large vocab): XLA gathers feed the kernel in their
    # natural row-major [Bp, D] layout -- no materialized transposes.
    heads = jnp.take(node_emb, head_ids, axis=0)     # (Bp, D)
    tails = jnp.take(node_emb, tail_ids, axis=0)     # (Bp, D)
    relas = jnp.take(rela_emb, rela_ids, axis=0)     # (Bp, D)

    in_spec = pl.BlockSpec((blk, D), lambda i: (i, 0))
    out_spec = pl.BlockSpec((blk, 1), lambda i: (i, 0))
    cost = pl.CostEstimate(
        flops=int(3 * Bp * D),
        transcendentals=0,
        bytes_accessed=int(Bp * D * (2 * n_isz + r_isz) + Bp * 4),
    )
    scores = pl.pallas_call(
        _distmult_stream_kernel,
        out_shape=jax.ShapeDtypeStruct((Bp, 1), jnp.float32),
        grid_spec=pltpu.PrefetchScalarGridSpec(
            num_scalar_prefetch=0,
            grid=(n_blocks,),
            in_specs=[in_spec, in_spec, in_spec],
            out_specs=out_spec,
        ),
        compiler_params=compiler_params,
        cost_estimate=cost,
    )(heads, tails, relas)
    return scores[:B, 0]


def xavier_uniform(key, shape):
    # torch xavier_uniform_ on an (out, in) weight: fan_out, fan_in = shape
    fan_out, fan_in = shape
    a = (6.0 / (fan_in + fan_out)) ** 0.5
    return jax.random.uniform(key, shape, jnp.float32, minval=-a, maxval=a)


if __name__ == "__main__":
    # args-equivalent small config
    node_vocab_size = 20
    rela_size = 5
    node_embed_dim = 32
    rela_embed_dim = 32   # must equal node_embed_dim for the elementwise score
    batch = 16

    key = jax.random.PRNGKey(0)
    k_node, k_rela, k_h, k_t, k_r = jax.random.split(key, 5)

    # xavier_uniform_ init; tables stored bf16 (halves the dominant HBM read
    # stream -- the kernel upcasts to f32 before any arithmetic).
    node_embeddings = xavier_uniform(
        k_node, (node_vocab_size, node_embed_dim)).astype(jnp.bfloat16)
    rela_embeddings = xavier_uniform(
        k_rela, (rela_size, rela_embed_dim)).astype(jnp.bfloat16)

    head_ids = jax.random.randint(k_h, (batch,), 0, node_vocab_size, jnp.int32)
    tail_ids = jax.random.randint(k_t, (batch,), 0, node_vocab_size, jnp.int32)
    rela_ids = jax.random.randint(k_r, (batch,), 0, rela_size, jnp.int32)

    # Pure-JAX reference of the module forward (on the stored-precision tables).
    node_f32 = node_embeddings.astype(jnp.float32)
    rela_f32 = rela_embeddings.astype(jnp.float32)
    ref = jnp.sum(node_f32[head_ids] * rela_f32[rela_ids] * node_f32[tail_ids],
                  axis=-1)

    # Fused path (tables VMEM-resident, gathers inside the kernel).
    scores_fused = jax.block_until_ready(
        rela_distmult_forward(node_embeddings, rela_embeddings,
                              head_ids, tail_ids, rela_ids))
    assert scores_fused.shape == (batch,)
    assert jnp.allclose(scores_fused, ref, atol=1e-4, rtol=1e-4)

    # Streaming fallback path (large-vocab code path), checked as well.
    scores_stream = jax.block_until_ready(
        rela_distmult_forward(node_embeddings, rela_embeddings,
                              head_ids, tail_ids, rela_ids,
                              force_streaming=True))
    assert scores_stream.shape == (batch,)
    assert jnp.allclose(scores_stream, ref, atol=1e-4, rtol=1e-4)

    print("KERNEL_OK")
</pallas_src>

<mosaic_0001>
module attributes {stable_mosaic.version = 11 : i64} {
  func.func @_distmult_fused_kernel(%arg0: i32, %arg1: memref<1x128xi32, #tpu.memory_space<vmem>>, %arg2: memref<1x128xi32, #tpu.memory_space<vmem>>, %arg3: memref<1x128xi32, #tpu.memory_space<vmem>>, %arg4: memref<32x20xbf16, #tpu.memory_space<vmem>>, %arg5: memref<32x5xbf16, #tpu.memory_space<vmem>>, %arg6: memref<1x128xf32, #tpu.memory_space<vmem>>) attributes {dimension_semantics = [#tpu.dimension_semantics<parallel>], iteration_bounds = array<i64: 1>, scalar_prefetch = 0 : i64, scratch_operands = 0 : i64, tpu.core_type = #tpu.core_type<tc>, window_params = [{transform_indices = @transform_0, window_bounds = array<i64: 1, 128>}, {transform_indices = @transform_1, window_bounds = array<i64: 1, 128>}, {transform_indices = @transform_2, window_bounds = array<i64: 1, 128>}, {pipeline_mode = #tpu.pipeline_mode<synchronous>, transform_indices = @transform_3, window_bounds = array<i64: 32, 20>}, {pipeline_mode = #tpu.pipeline_mode<synchronous>, transform_indices = @transform_4, window_bounds = array<i64: 32, 5>}, {transform_indices = @transform_5, window_bounds = array<i64: 1, 128>}]} {
    %c0 = arith.constant 0 : index
    %c0_0 = arith.constant 0 : index
    %0 = vector.load %arg4[%c0, %c0_0] : memref<32x20xbf16, #tpu.memory_space<vmem>>, vector<32x20xbf16>
    %1 = arith.extf %0 : vector<32x20xbf16> to vector<32x20xf32>
    %c0_1 = arith.constant 0 : index
    %c0_2 = arith.constant 0 : index
    %2 = vector.load %arg5[%c0_1, %c0_2] : memref<32x5xbf16, #tpu.memory_space<vmem>>, vector<32x5xbf16>
    %3 = arith.extf %2 : vector<32x5xbf16> to vector<32x5xf32>
    %c0_3 = arith.constant 0 : index
    %c0_4 = arith.constant 0 : index
    %4 = vector.load %arg1[%c0_3, %c0_4] : memref<1x128xi32, #tpu.memory_space<vmem>>, vector<1x128xi32>
    %5 = tpu.iota {dimensions = array<i32: 0>} : vector<20x128xi32>
    %6 = vector.broadcast %4 : vector<1x128xi32> to vector<20x128xi32>
    %7 = arith.cmpi eq, %5, %6 : vector<20x128xi32>
    %8 = arith.extui %7 : vector<20x128xi1> to vector<20x128xi32>
    %9 = arith.sitofp %8 : vector<20x128xi32> to vector<20x128xf32>
    %cst = arith.constant dense<0.000000e+00> : vector<32x128xf32>
    %10 = tpu.matmul %1, %9, %cst {dimension_numbers = #tpu.dot_dimension_numbers<[1], [0], [0], [1], [0, 0, 1, 1], [], []>} : vector<32x20xf32>, vector<20x128xf32>, vector<32x128xf32> -> vector<32x128xf32>
    %c0_5 = arith.constant 0 : index
    %c0_6 = arith.constant 0 : index
    %11 = vector.load %arg2[%c0_5, %c0_6] : memref<1x128xi32, #tpu.memory_space<vmem>>, vector<1x128xi32>
    %12 = tpu.iota {dimensions = array<i32: 0>} : vector<20x128xi32>
    %13 = vector.broadcast %11 : vector<1x128xi32> to vector<20x128xi32>
    %14 = arith.cmpi eq, %12, %13 : vector<20x128xi32>
    %15 = arith.extui %14 : vector<20x128xi1> to vector<20x128xi32>
    %16 = arith.sitofp %15 : vector<20x128xi32> to vector<20x128xf32>
    %cst_7 = arith.constant dense<0.000000e+00> : vector<32x128xf32>
    %17 = tpu.matmul %1, %16, %cst_7 {dimension_numbers = #tpu.dot_dimension_numbers<[1], [0], [0], [1], [0, 0, 1, 1], [], []>} : vector<32x20xf32>, vector<20x128xf32>, vector<32x128xf32> -> vector<32x128xf32>
    %c0_8 = arith.constant 0 : index
    %c0_9 = arith.constant 0 : index
    %18 = vector.load %arg3[%c0_8, %c0_9] : memref<1x128xi32, #tpu.memory_space<vmem>>, vector<1x128xi32>
    %19 = tpu.iota {dimensions = array<i32: 0>} : vector<5x128xi32>
    %20 = vector.broadcast %18 : vector<1x128xi32> to vector<5x128xi32>
    %21 = arith.cmpi eq, %19, %20 : vector<5x128xi32>
    %22 = arith.extui %21 : vector<5x128xi1> to vector<5x128xi32>
    %23 = arith.sitofp %22 : vector<5x128xi32> to vector<5x128xf32>
    %cst_10 = arith.constant dense<0.000000e+00> : vector<32x128xf32>
    %24 = tpu.matmul %3, %23, %cst_10 {dimension_numbers = #tpu.dot_dimension_numbers<[1], [0], [0], [1], [0, 0, 1, 1], [], []>} : vector<32x5xf32>, vector<5x128xf32>, vector<32x128xf32> -> vector<32x128xf32>
    %25 = arith.mulf %10, %24 : vector<32x128xf32>
    %26 = arith.mulf %25, %17 : vector<32x128xf32>
    %cst_11 = arith.constant dense<0.000000e+00> : vector<128xf32>
    %27 = vector.multi_reduction <add>, %26, %cst_11 [0] : vector<32x128xf32> to vector<128xf32>
    %28 = vector.shape_cast %27 : vector<128xf32> to vector<1x128xf32>
    %c0_12 = arith.constant 0 : index
    %c0_13 = arith.constant 0 : index
    %29 = vector.load %arg6[%c0_12, %c0_13] : memref<1x128xf32, #tpu.memory_space<vmem>>, vector<1x128xf32>
    tpu.vector_store %arg6[%c0_12, %c0_13], %28 {strides = array<i32>} : memref<1x128xf32, #tpu.memory_space<vmem>>, vector<1x128xf32>,
    return
  }
  func.func @transform_0(%arg0: i32) -> (i32, i32) {
    %c0_i32 = arith.constant 0 : i32
    %c0_i32_0 = arith.constant 0 : i32
    return %c0_i32, %arg0 : i32, i32
  }
  func.func @transform_1(%arg0: i32) -> (i32, i32) {
    %c0_i32 = arith.constant 0 : i32
    %c0_i32_0 = arith.constant 0 : i32
    return %c0_i32, %arg0 : i32, i32
  }
  func.func @transform_2(%arg0: i32) -> (i32, i32) {
    %c0_i32 = arith.constant 0 : i32
    %c0_i32_0 = arith.constant 0 : i32
    return %c0_i32, %arg0 : i32, i32
  }
  func.func @transform_3(%arg0: i32) -> (i32, i32) {
    %c0_i32 = arith.constant 0 : i32
    %c0_i32_0 = arith.constant 0 : i32
    %c0_i32_1 = arith.constant 0 : i32
    return %c0_i32, %c0_i32_0 : i32, i32
  }
  func.func @transform_4(%arg0: i32) -> (i32, i32) {
    %c0_i32 = arith.constant 0 : i32
    %c0_i32_0 = arith.constant 0 : i32
    %c0_i32_1 = arith.constant 0 : i32
    return %c0_i32, %c0_i32_0 : i32, i32
  }
  func.func @transform_5(%arg0: i32) -> (i32, i32) {
    %c0_i32 = arith.constant 0 : i32
    %c0_i32_0 = arith.constant 0 : i32
    return %c0_i32, %arg0 : i32, i32
  }
}

</mosaic_0001>

<bundles_post_ra>
// kernel: rela_distmult_forward.1
= control target key start
LH: loop header
LB: loop body
LE: loop exit
PB: predicated region body
PF: predicated region fallthrough
CT: control target
= control target key end

     0   :  { %v37_v0 = vlaneseq  ;;  %vm54_vm0 = vcmask 162816   ;;  %v500_v9 = vmov 0.0   ;;  %vm67_vm8 = vcmask 1043456   ;;  %s572_s0 = inlined_call_operand.vmem [shape: s32[1,128], index: 0, kind: input, shape index: {}]   ;;  %s573_s1 = inlined_call_operand.vmem [shape: s32[1,128], index: 1, kind: input, shape index: {}]   ;;  %s574_s3 = inlined_call_operand.vmem [shape: bf16[32,20], index: 3, kind: input, shape index: {}]   ;;  %s575_s2 = inlined_call_operand.vmem [shape: s32[1,128], index: 2, kind: input, shape index: {}]   ;;  %s576_s4 = inlined_call_operand.vmem [shape: bf16[32,5], index: 4, kind: input, shape index: {}]   ;;  %s577_s5 = inlined_call_operand.vmem [shape: f32[1,128], index: 5, kind: output, shape index: {}]  }
   0x1   :  { %v390_v1 = vld [vmem:[%s572_s0] ss:$0 sm:$0xff]  ;;  %v501_v11 = vmov 1.0|1.0   ;;  %v435_v14 = vld [vmem:[%s574_s3 + $0x8] sm:$0xff]   ;;  %vm279_vm11 = vcmask 1044480  }
   0x2   :  { %v420_v2 = vld [vmem:[%s574_s3] sm:$0xff]   ;;  %v38_v3 = vshrl.u32 %v37_v0, 7  ;;  %v425_v17 = vunpack.c.l.bf16 %v435_v14  ;;  %v436_v18 = vld [vmem:[%s576_s4 + $0x8] sm:$0xff]   ;;  %v426_v19 = vunpack.c.h.bf16 %v435_v14  ;;  %vm266_vm12 = vcmask 39936  }
   0x3   :  { %v401_v4 = vld [vmem:[%s573_s1] ss:$0 sm:$0xff]  ;;  %v421_v5 = vunpack.c.l.bf16 %v420_v2  ;;  %v422_v13 = vunpack.c.h.bf16 %v420_v2  ;;  %v433_v21 = vunpack.c.l.bf16 %v436_v18  ;;  %v434_v23 = vunpack.c.h.bf16 %v436_v18 }
   0x4   :  { %v39_v6 = vadd.s32 8, %v38_v3  ;;  %vm45_vm1 = vcmp.eq.s32.totalorder %v38_v3, %v390_v1  ;;  %v40_v7 = vadd.s32 16, %v38_v3  ;;  %vm161_vm2 = vcmp.eq.s32.totalorder %v38_v3, %v401_v4  ;;  %v412_v8 = vld [vmem:[%s575_s2] ss:$0 sm:$0xff] }
   0x5   :  { %462 = vmatprep.mubr.msk.f32.mxu0 %vm54_vm0, %v421_v5  ;;  %474 = vmatprep.mubr.msk.f32.mxu1 %vm54_vm0, %v421_v5  ;;  %vm263_vm10 = vcmp.eq.s32.totalorder %v38_v3, %v412_v8  ;;  %v428_v16 = vld [vmem:[%s576_s4] sm:$0xff]  }
   0x6   :  { %vm46_vm3 = vcmp.eq.s32.totalorder %v39_v6, %v390_v1  ;;  %vm162_vm4 = vcmp.eq.s32.totalorder %v39_v6, %v401_v4  ;;  %vm47_vm5 = vcmp.eq.s32.totalorder %v40_v7, %v390_v1  ;;  %vm163_vm6 = vcmp.eq.s32.totalorder %v40_v7, %v401_v4 }
   0x7   :  { %vm488_vm7 = vmpackc.low %vm46_vm3, %vm45_vm1  ;;  %v393_v10 = vsel %vm47_vm5, 1.0, %v500_v9  ;;  %v404_v12 = vsel %vm163_vm6, 1.0, %v500_v9  ;;  %v413_v15 = vsel %vm263_vm10, 1.0, %v500_v9  ;;  %v429_v20 = vunpack.c.l.bf16 %v428_v16 }
   0x8   :  { %489 = vmatprep.subr.msk.bf16.mxu0 %vm488_vm7, %v501_v11  ;;  %vm492_vm9 = vmpackc.low %vm162_vm4, %vm161_vm2  ;;  %v430_v22 = vunpack.c.h.bf16 %v428_v16 }
   0x9   :  { %493 = vmatprep.subr.msk.bf16.mxu1 %vm492_vm9, %v501_v11  ;;  %491 = vmatpush3.bf16.msk.msra.mxu0 %vm488_vm7, %v501_v11 }
   0xa   :  { %495 = vmatpush3.bf16.msk.msra.mxu1 %vm492_vm9, %v501_v11  ;;  %460 = vmatprep.subr.msk.mxu0 %vm67_vm8, %v393_v10 }
   0xb   :  { %472 = vmatprep.subr.msk.mxu1 %vm67_vm8, %v404_v12 }
   0xd   :  { %461 = vmatpush3.msk.msra.mxu0 %vm67_vm8, %v393_v10 }
   0xe   :  { %473 = vmatpush3.msk.msra.mxu1 %vm67_vm8, %v404_v12  ;;  %463 = vmatmul.mubr.msk.f32.vlgmr.msra.gmra.mrb[0].mxu0 %vm54_vm0, %v422_v13 }
   0xf   :  { %475 = vmatmul.mubr.msk.f32.vlgmr.msra.gmra.mrb[0].mxu1 %vm54_vm0, %v422_v13  ;;  %480 = vmatprep.subr.msk.mxu0 %vm279_vm11, %v413_v15 }
  0x10   :  { %481 = vmatpush3.msk.msra.mxu0 %vm279_vm11, %v413_v15  ;;  %496 = vmatprep.subr.msk.mxu1 %vm279_vm11, %v413_v15 }
  0x11   :  { %465 = vmatprep.mubr.msk.f32.mxu0 %vm54_vm0, %v425_v17  ;;  %477 = vmatprep.mubr.msk.f32.mxu1 %vm54_vm0, %v425_v17 }
  0x12   :  { %497 = vmatpush3.msk.msra.mxu1 %vm279_vm11, %v413_v15  ;;  %466 = vmatmul.mubr.msk.f32.gmra.mrb[2].mxu0 %vm54_vm0, %v426_v19 }
  0x13   :  { %478 = vmatmul.mubr.msk.f32.gmra.mrb[2].mxu1 %vm54_vm0, %v426_v19  ;;  %482 = vmatprep.mubr.msk.f32.mxu0 %vm266_vm12, %v429_v20 }
  0x14   :  { %485 = vmatprep.mubr.msk.f32.mxu1 %vm266_vm12, %v433_v21 }
  0x16   :  { %483 = vmatmul.mubr.msk.f32.vlgmr.msra.gmra.mrb[4].mxu0 %vm266_vm12, %v430_v22 }
  0x17   :  { %486 = vmatmul.mubr.msk.f32.vlgmr.msra.gmra.mrb[4].mxu1 %vm266_vm12, %v434_v23 }
  0xe1   :  { %v464_v24 = vpop.f32.mrb[0].mxu0 }
  0xe2   :  { %v137_v25 = vpop.f32.mrb[1].mxu0  ;;  %v476_v26 = vpop.f32.mrb[0].mxu1 }
  0xe3   :  { %v239_v27 = vpop.f32.mrb[1].mxu1 }
  0xe5   :  { %v467_v28 = vpop.f32.mrb[2].mxu0 }
  0xe6   :  { %v147_v29 = vpop.f32.mrb[3].mxu0  ;;  %v479_v30 = vpop.f32.mrb[2].mxu1 }
  0xe7   :  { %v249_v31 = vpop.f32.mrb[3].mxu1 }
  0xe9   :  { %v484_v32 = vpop.f32.mrb[4].mxu0 }
  0xea   :  { %v369_v33 = vmul.f32 %v484_v32, %v464_v24  ;;  %v487_v34 = vpop.f32.mrb[4].mxu1  ;;  %v349_v35 = vpop.f32.mrb[5].mxu0 }
  0xeb   :  { %v371_v36 = vmul.f32 %v487_v34, %v467_v28  ;;  %v368_v37 = vmul.f32 %v349_v35, %v137_v25  ;;  %v359_v38 = vpop.f32.mrb[5].mxu1 }
  0xec   :  { %v373_v39 = vmul.f32 %v476_v26, %v369_v33  ;;  %v370_v40 = vmul.f32 %v359_v38, %v147_v29 }
  0xed   :  { %v375_v41 = vmul.f32 %v479_v30, %v371_v36  ;;  %v372_v42 = vmul.f32 %v368_v37, %v239_v27 }
  0xee   :  { %v374_v43 = vmul.f32 %v370_v40, %v249_v31 }
  0xef   :  { %v376_v44 = vadd.f32 %v373_v39, %v372_v42 }
  0xf1   :  { %v377_v45 = vadd.f32 %v376_v44, %v374_v43 }
  0xf3   :  { %v378_v46 = vadd.f32 %v377_v45, %v375_v41 }
  0xf5   :  { %v379_v47 = vrot.slane %v378_v46, 4 }
  0xf7   :  { %v380_v48 = vadd.f32 %v379_v47, %v378_v46 }
  0xf9   :  { %v381_v49 = vrot.slane %v380_v48, 2 }
  0xfb   :  { %v382_v50 = vadd.f32 %v381_v49, %v380_v48 }
  0xfd   :  { %v383_v51 = vrot.slane %v382_v50, 1 }
  0xff   :  { %v384_v52 = vadd.f32 %v383_v51, %v382_v50 }
 0x101   :  { %385 = vst [vmem:[%s577_s5] sm:$0x1] %v384_v52 }

</bundles_post_ra>
